<compile_context>
chip_gen: v6e
topology: v6e:2x2x1
jax: 0.10.0
libtpu: 0.0.40
codegen_flags: <defaults>
</compile_context>

<pallas_src>
import jax
import jax.numpy as jnp
from jax.experimental import pallas as pl
from jax.experimental.pallas import tpu as pltpu


def _decoder_rank_kernel(q_ref, d_ref, w_ref, out_ref):
    Bb, Lq, D = q_ref.shape
    Ld = d_ref.shape[1]

    # Flatten (Bb, Lq) into one M dimension so the projection is a single
    # dense (Bb*Lq, D) x (D, D) MXU matmul (Lq is sublane-aligned, so this
    # collapse is layout-free).
    q2d = q_ref[...].reshape(Bb * Lq, D)
    qp = jnp.dot(q2d, w_ref[...],
                 preferred_element_type=jnp.float32).reshape(Bb, Lq, D)

    # ranks = q_proj @ docs^T via a batched contraction over D — no explicit
    # transpose / relayout of docs.
    scores = jnp.einsum('bqd,bkd->bqk', qp, d_ref[...],
                        preferred_element_type=jnp.float32)   # (Bb, Lq, Ld)

    # torch.max(ranks, dim=1)[0]: max over the query-chunk axis (XLU reduce).
    ranks = jnp.max(scores, axis=1)                            # (Bb, Ld)

    # Sigmoid on the EUP transcendental path; f32 elementwise.
    out_ref[...] = jax.nn.sigmoid(ranks)


def _pick_block_batch(B, Lq, target_rows=512):
    """How many batch elements to fold per grid step.

    Prefer a multiple-of-8 divisor of B (sublane-aligned output block) that
    keeps the flattened matmul M-dim <= target_rows and leaves >= 2 grid steps
    (useful for v7x's two TensorCores); otherwise fold all of B (toy sizes).
    """
    candidates = [bb for bb in range(8, B, 8)
                  if B % bb == 0 and bb * Lq <= target_rows]
    if candidates:
        return max(candidates)
    return B


def decoder_rank_simple(docs_chunks, query_chunks, w):
    """docs_chunks: (B, Ld, D), query_chunks: (B, Lq, D), w: (D, D) -> (B, Ld)."""
    B, Ld, D = docs_chunks.shape
    Lq = query_chunks.shape[1]
    assert query_chunks.shape == (B, Lq, D)
    assert w.shape == (D, D)

    Bb = _pick_block_batch(B, Lq)
    grid = (B // Bb,)

    out = pl.pallas_call(
        _decoder_rank_kernel,
        out_shape=jax.ShapeDtypeStruct((B, Ld), jnp.float32),
        grid_spec=pltpu.PrefetchScalarGridSpec(
            num_scalar_prefetch=0,
            grid=grid,
            in_specs=[
                pl.BlockSpec((Bb, Lq, D), lambda b: (b, 0, 0)),   # query_chunks
                pl.BlockSpec((Bb, Ld, D), lambda b: (b, 0, 0)),   # docs_chunks
                # Constant index_map -> weight stays resident across grid steps.
                pl.BlockSpec((D, D), lambda b: (0, 0)),           # w
            ],
            out_specs=pl.BlockSpec((Bb, Ld), lambda b: (b, 0)),
        ),
        compiler_params=pltpu.CompilerParams(
            dimension_semantics=("parallel",)),
    )(query_chunks, docs_chunks, w)
    return out


def reference_forward(docs_chunks, query_chunks, w):
    """Pure-JAX reference matching the PyTorch forward."""
    hp = jax.lax.Precision.HIGHEST
    qp = jnp.einsum('bqd,de->bqe', query_chunks, w, precision=hp)
    ranks = jnp.einsum('bqe,bke->bqk', qp, docs_chunks, precision=hp)
    ranks = jnp.max(ranks, axis=1)
    return jax.nn.sigmoid(ranks)


if __name__ == "__main__":
    # Small shapes consistent with the module: batch=2, query chunks=8,
    # doc chunks=16, d_model=32.
    B, Lq, Ld, D = 2, 8, 16, 32

    key = jax.random.PRNGKey(0)
    k_docs, k_query, k_w = jax.random.split(key, 3)
    docs_chunks = jax.random.normal(k_docs, (B, Ld, D), dtype=jnp.float32)
    query_chunks = jax.random.normal(k_query, (B, Lq, D), dtype=jnp.float32)
    w = 0.1 * jax.random.normal(k_w, (D, D), dtype=jnp.float32)

    out = decoder_rank_simple(docs_chunks, query_chunks, w)
    jax.block_until_ready(out)

    out_ref = reference_forward(docs_chunks, query_chunks, w)
    assert out.shape == (B, Ld)
    assert jnp.allclose(out, out_ref, rtol=2e-3, atol=2e-3), "output mismatch"

    print("KERNEL_OK")
</pallas_src>

<mosaic_0001>
module attributes {stable_mosaic.version = 11 : i64} {
  func.func @_decoder_rank_kernel(%arg0: i32, %arg1: memref<2x8x32xf32, #tpu.memory_space<vmem>>, %arg2: memref<2x16x32xf32, #tpu.memory_space<vmem>>, %arg3: memref<32x32xf32, #tpu.memory_space<vmem>>, %arg4: memref<2x16xf32, #tpu.memory_space<vmem>>) attributes {dimension_semantics = [#tpu.dimension_semantics<parallel>], iteration_bounds = array<i64: 1>, scalar_prefetch = 0 : i64, scratch_operands = 0 : i64, tpu.core_type = #tpu.core_type<tc>, window_params = [{transform_indices = @transform_0, window_bounds = array<i64: 2, 8, 32>}, {transform_indices = @transform_1, window_bounds = array<i64: 2, 16, 32>}, {pipeline_mode = #tpu.pipeline_mode<synchronous>, transform_indices = @transform_2, window_bounds = array<i64: 32, 32>}, {transform_indices = @transform_3, window_bounds = array<i64: 2, 16>}]} {
    %c0 = arith.constant 0 : index
    %c0_0 = arith.constant 0 : index
    %c0_1 = arith.constant 0 : index
    %0 = vector.load %arg1[%c0, %c0_0, %c0_1] : memref<2x8x32xf32, #tpu.memory_space<vmem>>, vector<2x8x32xf32>
    %1 = vector.shape_cast %0 : vector<2x8x32xf32> to vector<16x32xf32>
    %c0_2 = arith.constant 0 : index
    %c0_3 = arith.constant 0 : index
    %2 = vector.load %arg3[%c0_2, %c0_3] : memref<32x32xf32, #tpu.memory_space<vmem>>, vector<32x32xf32>
    %cst = arith.constant dense<0.000000e+00> : vector<16x32xf32>
    %3 = tpu.matmul %1, %2, %cst {dimension_numbers = #tpu.dot_dimension_numbers<[1], [0], [0], [1], [0, 0, 1, 1], [], []>} : vector<16x32xf32>, vector<32x32xf32>, vector<16x32xf32> -> vector<16x32xf32>
    %4 = vector.shape_cast %3 : vector<16x32xf32> to vector<2x8x32xf32>
    %c0_4 = arith.constant 0 : index
    %c0_5 = arith.constant 0 : index
    %c0_6 = arith.constant 0 : index
    %5 = vector.load %arg2[%c0_4, %c0_5, %c0_6] : memref<2x16x32xf32, #tpu.memory_space<vmem>>, vector<2x16x32xf32>
    "tpu.trace_start"() <{level = 10 : i32, message = "bqd,bkd->bqk"}> : () -> ()
    %cst_7 = arith.constant dense<0.000000e+00> : vector<2x8x16xf32>
    %6 = tpu.matmul %4, %5, %cst_7 {dimension_numbers = #tpu.dot_dimension_numbers<[2], [2], [1], [1], [0, 0, 0, 1, 1, 1], [0], [0]>} : vector<2x8x32xf32>, vector<2x16x32xf32>, vector<2x8x16xf32> -> vector<2x8x16xf32>
    "tpu.trace_stop"() : () -> ()
    %cst_8 = arith.constant dense<0xFF800000> : vector<2x16xf32>
    %7 = vector.multi_reduction <maximumf>, %6, %cst_8 [1] : vector<2x8x16xf32> to vector<2x16xf32>
    %8 = arith.negf %7 : vector<2x16xf32>
    %9 = math.exp %8 : vector<2x16xf32>
    %cst_9 = arith.constant 1.000000e+00 : f32
    %10 = vector.broadcast %cst_9 : f32 to vector<2x16xf32>
    %11 = arith.addf %10, %9 : vector<2x16xf32>
    %12 = arith.divf %10, %11 : vector<2x16xf32>
    %c0_10 = arith.constant 0 : index
    %c0_11 = arith.constant 0 : index
    %13 = vector.load %arg4[%c0_10, %c0_11] : memref<2x16xf32, #tpu.memory_space<vmem>>, vector<2x16xf32>
    tpu.vector_store %arg4[%c0_10, %c0_11], %12 {strides = array<i32>} : memref<2x16xf32, #tpu.memory_space<vmem>>, vector<2x16xf32>,
    return
  }
  func.func @transform_0(%arg0: i32) -> (i32, i32, i32) {
    %c0_i32 = arith.constant 0 : i32
    %c0_i32_0 = arith.constant 0 : i32
    %c0_i32_1 = arith.constant 0 : i32
    return %arg0, %c0_i32, %c0_i32_0 : i32, i32, i32
  }
  func.func @transform_1(%arg0: i32) -> (i32, i32, i32) {
    %c0_i32 = arith.constant 0 : i32
    %c0_i32_0 = arith.constant 0 : i32
    %c0_i32_1 = arith.constant 0 : i32
    return %arg0, %c0_i32, %c0_i32_0 : i32, i32, i32
  }
  func.func @transform_2(%arg0: i32) -> (i32, i32) {
    %c0_i32 = arith.constant 0 : i32
    %c0_i32_0 = arith.constant 0 : i32
    %c0_i32_1 = arith.constant 0 : i32
    return %c0_i32, %c0_i32_0 : i32, i32
  }
  func.func @transform_3(%arg0: i32) -> (i32, i32) {
    %c0_i32 = arith.constant 0 : i32
    %c0_i32_0 = arith.constant 0 : i32
    return %arg0, %c0_i32 : i32, i32
  }
}

</mosaic_0001>

<bundles_post_ra>
// kernel: tpu_custom_call.1
= control target key start
LH: loop header
LB: loop body
LE: loop exit
PB: predicated region body
PF: predicated region fallthrough
CT: control target
= control target key end

     0   :  { %8 = vsyncpa [#allocation3], 0  ;;  %s553_s0 = inlined_call_operand.hbm [shape: f32[2,8,32], index: 0, kind: input, shape index: {}]   ;;  %s554_s1 = inlined_call_operand.hbm [shape: f32[2,16,32], index: 1, kind: input, shape index: {}]   ;;  %s555_s2 = inlined_call_operand.hbm [shape: f32[32,32], index: 2, kind: input, shape index: {}]   ;;  %s556_s3 = inlined_call_operand.hbm [shape: f32[2,16], index: 3, kind: output, shape index: {}]  }
   0x1   :  { %9 = vsyncpa [#allocation6], 0 }
   0x2   :  { %10 = vsyncpa [#allocation4], 0  ;;  %s505_s12 = smov [#allocation5]   ;;  %s506_s14 = smov [#allocation2]  }
   0x3   :  { %s28_s13 = sshll.u32 %s505_s12, 4  ;;  %s16_s15 = sshll.u32 %s506_s14, 4  ;;  %s29_s13 = int_to_ptr.vmem [resolvable:$true] %s28_s13  ;;  %s17_s15 = int_to_ptr.vmem [resolvable:$true] %s16_s15 }
   0x4   :  { %s427_s16 = scalar_lea.vmem %s29_s13, 512  ;;  %p432_p1 = scmp.lt.s32.totalorder %s29_s13, %s29_s13 }
   0x5   :  { %p428_p0 = scmp.ne.s32.totalorder %s29_s13, %s427_s16  ;;  %p433_p2 = scmp.lt.s32.totalorder %s427_s16, %s427_s16 }
   0x7   :  { %p434_p3 = por %p433_p2, %p432_p1 }
   0x9   :  { %p435_p4 = pnand %p434_p3, %p428_p0 }
   0xb   :  { %438 = shalt.err (!%p435_p4)
}
   0xc   :  { %s507_s17 = smov 128   ;;  %s508_s18 = smov 8  }
   0xd   :  { %34 = dma.hbm_to_vmem [thread:$0]  %s554_s1, 512, %s29_s13, [#allocation6], %s507_s17, %s507_s17, %s508_s18  }
   0xe   :  { %s447_s21 = scalar_lea.vmem %s17_s15, 256  ;;  %p452_p6 = scmp.lt.s32.totalorder %s17_s15, %s17_s15 }
   0xf   :  { %p448_p5 = scmp.ne.s32.totalorder %s17_s15, %s447_s21  ;;  %p453_p7 = scmp.lt.s32.totalorder %s447_s21, %s447_s21 }
  0x11   :  { %p454_p8 = por %p453_p7, %p452_p6 }
  0x13   :  { %p455_p9 = pnand %p454_p8, %p448_p5 }
  0x15   :  { %458 = shalt.err (!%p455_p9)
}
  0x16   :  { %22 = dma.hbm_to_vmem [thread:$0]  %s553_s0, 256, %s17_s15, [#allocation3], %s507_s17, %s507_s17, %s508_s18  }
  0x17   :  { %s509_s24 = smov [#allocation7]  }
  0x18   :  { %s40_s25 = sshll.u32 %s509_s24, 4  ;;  %s41_s25 = int_to_ptr.vmem [resolvable:$true] %s40_s25 }
  0x19   :  { %s467_s26 = scalar_lea.vmem %s41_s25, 512  ;;  %p472_p11 = scmp.lt.s32.totalorder %s41_s25, %s41_s25 }
  0x1a   :  { %p468_p10 = scmp.ne.s32.totalorder %s41_s25, %s467_s26  ;;  %p473_p12 = scmp.lt.s32.totalorder %s467_s26, %s467_s26 }
  0x1c   :  { %p474_p13 = por %p473_p12, %p472_p11 }
  0x1e   :  { %p475_p0 = pnand %p474_p13, %p468_p10 }
  0x20   :  { %478 = shalt.err (!%p475_p0)
}
  0x21   :  { %46 = dma.hbm_to_vmem [thread:$0]  %s555_s2, 512, %s41_s25, [#allocation6], %s507_s17, %s507_s17, %s508_s18  }
  0x22   :  { %499 = dma.done.wait [#allocation3], 256  }
  0x23   :  { %500 = vsyncadd [#allocation3], 4294967040 }
  0x24   :  { %501 = dma.done.wait [#allocation6], 1024  }
  0x25   :  { %502 = vsyncadd [#allocation6], 4294966272  ;;  %v510_v0 = vmov 0.0   ;;  %vm62_vm0 = vcmask 261120   ;;  %v61_v1 = vld [vmem:[#allocation7 + $0x18] sm:$0xff]  ;;  %v60_v2 = vld [vmem:[#allocation7 + $0x10] sm:$0xff] }
  0x26   :  { %389 = vmatprep.subr.mxu1 %v510_v0  ;;  %378 = vmatprep.subr.mxu0 %v61_v1  ;;  %v56_v3 = vld [vmem:[#allocation2] sm:$0xff]  ;;  %v59_v4 = vld [vmem:[#allocation7 + $0x8] sm:$0xff]  ;;  %v58_v6 = vld [vmem:[#allocation7] sm:$0xff]  ;;  %vm511_vm1 = vmmov 0   ;;  %vm306_vm2 = vcmask 130048   ;;  %s512_s0 = smov [#allocation8]  }
  0x27   :  { %379 = vmatpush3.msra.mxu0 %v61_v1  ;;  %386 = vmatprep.mubr.msk.f32.mxu0 %vm62_vm0, %v56_v3  ;;  %v145_v5 = vld [vmem:[#allocation5 + $0x8] sm:$0xff]  ;;  %v57_v7 = vld [vmem:[#allocation2 + $0x8] sm:$0xff]  ;;  %v146_v9 = vld [vmem:[#allocation5 + $0x10] sm:$0xff]  ;;  %s346_s2 = sshll.u32 %s512_s0, 4  ;;  %vm335_vm3 = vcmask 1041409   ;;  %vm338_vm4 = vcmask 123904   ;;  %s347_s2 = int_to_ptr.vmem [resolvable:$true] %s346_s2 }
  0x28   :  { %380 = vmatprep.subr.mxu0 %v60_v2  ;;  %390 = vmatpush3.xpose.msk.msra.mxu1 %vm62_vm0, %v145_v5  ;;  %v147_v8 = vld [vmem:[#allocation5 + $0x18] sm:$0xff]  ;;  %v144_v10 = vld [vmem:[#allocation5] sm:$0xff]  ;;  %s479_s28 = scalar_lea.vmem %s347_s2, 32  ;;  %p484_p2 = scmp.lt.s32.totalorder %s347_s2, %s347_s2 }
  0x29   :  { %381 = vmatpush3.msra.mxu0 %v60_v2  ;;  %391 = vmatprep.subr.mxu1 %v510_v0  ;;  %p480_p1 = scmp.ne.s32.totalorder %s347_s2, %s479_s28  ;;  %p485_p3 = scmp.lt.s32.totalorder %s479_s28, %s479_s28 }
  0x2a   :  { %382 = vmatprep.subr.mxu0 %v59_v4  ;;  %393 = vmatprep.mubr.msk.f32.mxu1 %vm511_vm1, %v510_v0 }
  0x2b   :  { %383 = vmatpush3.msra.mxu0 %v59_v4  ;;  %p486_p4 = por %p485_p3, %p484_p2 }
  0x2c   :  { %384 = vmatprep.subr.mxu0 %v58_v6  ;;  %392 = vmatpush3.xpose.msk.msra.mxu1 %vm62_vm0, %v144_v10 }
  0x2d   :  { %385 = vmatpush3.msra.mxu0 %v58_v6  ;;  %p487_p5 = pnand %p486_p4, %p480_p1 }
  0x2e   :  { %387 = vmatmul.mubr.msk.f32.vlgmr.msra.gmra.mxu0 %vm62_vm0, %v57_v7  ;;  %396 = vmatprep.subr.mxu0 %v510_v0 }
  0x2f   :  { %397 = vmatpush3.xpose.msk.msra.mxu0 %vm62_vm0, %v147_v8  ;;  %400 = vmatprep.mubr.msk.f32.mxu0 %vm511_vm1, %v510_v0 }
  0x30   :  { %398 = vmatprep.subr.mxu0 %v510_v0 }
  0x33   :  { %399 = vmatpush3.xpose.msk.msra.mxu0 %vm62_vm0, %v146_v9 }
  0xee   :  { %v388_v11 = vpop.f32.mrf.mxu0 }
  0xef   :  { %401 = vmatmul.mubr.msk.f32.vlgmr.msra.gmra.mxu0 %vm62_vm0, %v388_v11 }
  0xf0   :  { %v135_v12 = vpop.f32.mrf.mxu0 }
  0xf1   :  { %394 = vmatmul.mubr.msk.f32.vlgmr.msra.gmra.mxu1 %vm62_vm0, %v135_v12 }
 0x1af   :  { %v302_v13 = vpop.f32.mrf.mxu0 }
 0x1b0   :  { %v314_v14 = vsel %vm306_vm2, %v302_v13, -inf }
 0x1b1   :  { %v315_v15 = vrot.slane %v314_v14, 4  ;;  %v223_v16 = vpop.f32.mrf.mxu1  ;;  %v402_v17 = vpop.f32.mrf.mxu0 }
 0x1b2   :  { %v307_v18 = vsel %vm306_vm2, %v223_v16, -inf }
 0x1b3   :  { %v316_v19 = vmax.f32 %v314_v14, %v315_v15  ;;  %v308_v20 = vrot.slane %v307_v18, 4  ;;  %v395_v21 = vpop.f32.mrf.mxu1 }
 0x1b5   :  { %v317_v22 = vrot.slane %v316_v19, 2  ;;  %v309_v23 = vmax.f32 %v307_v18, %v308_v20 }
 0x1b7   :  { %v318_v24 = vmax.f32 %v316_v19, %v317_v22  ;;  %v310_v25 = vrot.slane %v309_v23, 2 }
 0x1b9   :  { %v319_v26 = vrot.slane %v318_v24, 1  ;;  %v311_v27 = vmax.f32 %v309_v23, %v310_v25 }
 0x1bb   :  { %v320_v28 = vmax.f32 %v318_v24, %v319_v26  ;;  %v312_v29 = vrot.slane %v311_v27, 1 }
 0x1bd   :  { %v365_v30 = vmul.f32 -1.442695, %v320_v28  ;;  %v313_v31 = vmax.f32 %v311_v27, %v312_v29 }
 0x1bf   :  { %411 = vpow2.f32 %v365_v30  ;;  %v364_v32 = vmul.f32 -1.442695, %v313_v31 }
 0x1c1   :  { %413 = vpow2.f32 %v364_v32 }
 0x1cc   :  { %v412_v33 = vpop.eup %411 }
 0x1cd   :  { %v328_v34 = vadd.f32 1.0, %v412_v33 }
 0x1ce   :  { %v414_v35 = vpop.eup %413 }
 0x1cf   :  { %v327_v36 = vadd.f32 1.0, %v414_v35  ;;  %415 = vrcp.f32 %v328_v34 }
 0x1d1   :  { %417 = vrcp.f32 %v327_v36 }
 0x1dc   :  { %v416_v37 = vpop.eup %415 }
 0x1de   :  { %v418_v38 = vpop.eup %417 }
 0x1df   :  { %v336_v39 = vsel %vm335_vm3, %v416_v37, %v418_v38 }
 0x1e0   :  { %339 = vst.msk [vmem:[#allocation8] sm:$0x3] %vm338_vm4, %v336_v39 }
 0x1e1   :  { %490 = shalt.err (!%p487_p5)
}
 0x1e2   :  { %349 = dma.vmem_to_hbm [thread:$0]  %s347_s2, 32, %s556_s3, [#allocation4]  }
 0x1e3   :  { %503 = dma.done.wait [#allocation4], 32  }
 0x1e4   :  { %504 = vsyncadd [#allocation4], 4294967264 }
 0x1e5   :  { %353 = vsyncpa [#allocation3], 1 }
 0x1e6   :  { %354 = vsyncpa [#allocation6], 1 }
 0x1e7   :  { %355 = vsyncpa [#allocation4], 1 }

</bundles_post_ra>
